<compile_context>
chip_gen: v7x
topology: tpu7x:2x2x1
jax: 0.10.0
libtpu: 0.0.40
codegen_flags: <defaults>
</compile_context>

<pallas_src>
import functools

import jax
import jax.numpy as jnp
from jax.experimental import pallas as pl
from jax.experimental.pallas import tpu as pltpu


def _distill_kl_kernel(ys_ref, yt_ref, out_ref, *, inv_T, n_rows, tile_rows,
                       need_mask, use_mxu_sums):
    # Load the (TB, C) tile; promote to f32 (f32 math everywhere; required on
    # v5e where the VPU/EUP have no bf16 path).
    ys = ys_ref[...].astype(jnp.float32) * inv_T
    yt = yt_ref[...].astype(jnp.float32) * inv_T

    # Row-stable shifts (per-row maxes: garbage tail rows only affect
    # themselves; all reductions below are along the class/lane axis).
    m_s = jnp.max(ys, axis=1, keepdims=True)
    zs = ys - m_s
    m_t = jnp.max(yt, axis=1, keepdims=True)
    zt = yt - m_t

    e_s = jnp.exp(zs)                       # student exp(shifted logits)
    e_t = jnp.exp(zt)                       # teacher exp(shifted logits)
    prod = e_t * (zt - zs)                  # e_t*(zt - zs); no log_p_s tile

    if use_mxu_sums:
        # Offload lane-axis sums to the otherwise-idle MXU (v7x relief when the
        # XLU slot saturates); the two maxes above stay on the XLU.
        ones = jnp.ones((ys.shape[1], 1), jnp.float32)
        sum_s = jnp.dot(e_s, ones, preferred_element_type=jnp.float32)
        sum_t = jnp.dot(e_t, ones, preferred_element_type=jnp.float32)
        num = jnp.dot(prod, ones, preferred_element_type=jnp.float32)
    else:
        sum_s = jnp.sum(e_s, axis=1, keepdims=True)     # (TB, 1)
        sum_t = jnp.sum(e_t, axis=1, keepdims=True)     # (TB, 1)
        num = jnp.sum(prod, axis=1, keepdims=True)      # (TB, 1)

    # Per-row folded KL:
    #   sum_c p_t*(log p_t - log p_s)
    #     = sum_c e_t*(zt - zs)/sum_t + log(sum_s) - log(sum_t)
    # Only column-shaped ops here (exact divide, not approx reciprocal).
    kl_row = num / sum_t + jnp.log(sum_s) - jnp.log(sum_t)

    if need_mask:
        # Partial last block: padded rows may hold garbage -> Inf/NaN, but
        # jnp.where selects 0.0 for them (NaN in the unselected operand does
        # not propagate), so they contribute exactly 0 to the sum.
        row_ids = pl.program_id(0) * tile_rows + jax.lax.broadcasted_iota(
            jnp.int32, (tile_rows, 1), 0)
        kl_row = jnp.where(row_ids < n_rows, kl_row, 0.0)

    # Per-tile partial sum (un-scaled); scaling/reduction happens in the wrapper.
    out_ref[0, 0] = jnp.sum(kl_row)


def distill_kl(y_s, y_t, T, *, tile_rows=None, use_mxu_sums=False):
    """Pallas TPU implementation of DistillKL.forward. y_s, y_t: (B, C)."""
    assert y_s.shape == y_t.shape and y_s.ndim == 2
    B, C = y_s.shape
    in_itemsize = jnp.dtype(y_s.dtype).itemsize
    # Sublane pack width: 8 rows for f32, 16 for bf16/f16, 32 for int8/fp8.
    pack = max(8, 32 // max(1, in_itemsize))

    # --- VMEM budget & explicit limit ------------------------------------
    # v5e/v6e: 128 MiB physical per TC; v7x: 64 MiB per TC. Use 3/4 of the
    # queried capacity (capped at 96 MiB) as the scoped limit, and size the
    # tile to ~3/4 of that limit for extra headroom.
    try:
        info = pltpu.get_tpu_info()
        vmem_cap = int(getattr(info, "vmem_capacity_bytes", 64 * 1024 * 1024))
    except Exception:
        vmem_cap = 64 * 1024 * 1024                # conservative (v7x per-TC)
    vmem_limit = min(vmem_cap * 3 // 4, 96 * 1024 * 1024)
    tile_budget = vmem_limit * 3 // 4

    # Per-batch-row footprint:
    #   inputs : 2 arrays x 2 pipeline buffers x C x in_itemsize
    #   temps  : ~6 live full-tile f32 temporaries x C x 4
    bytes_per_row = max(1, C * (2 * 2 * in_itemsize + 6 * 4))

    if tile_rows is None:
        tb = max(pack, tile_budget // bytes_per_row)
    else:
        tb = max(pack, int(tile_rows))
    tb = (int(tb) // pack) * pack
    tb = min(tb, 8192)                              # sanity cap
    tb = min(tb, pl.cdiv(B, pack) * pack)           # never exceed padded batch

    num_tiles = pl.cdiv(B, tb)
    need_mask = (num_tiles * tb != B)               # ragged tail -> mask only

    kernel = functools.partial(
        _distill_kl_kernel,
        inv_T=1.0 / float(T),
        n_rows=B,
        tile_rows=tb,
        need_mask=need_mask,
        use_mxu_sums=use_mxu_sums,
    )

    cost = pl.CostEstimate(
        flops=8 * B * C,
        transcendentals=2 * B * C,
        bytes_accessed=2 * B * C * in_itemsize + num_tiles * 4,
    )

    partials = pl.pallas_call(
        kernel,
        out_shape=jax.ShapeDtypeStruct((num_tiles, 1), jnp.float32),
        grid=(num_tiles,),
        in_specs=[
            pl.BlockSpec((tb, C), lambda i: (i, 0)),
            pl.BlockSpec((tb, C), lambda i: (i, 0)),
        ],
        out_specs=pl.BlockSpec((1, 1), lambda i: (i, 0),
                               memory_space=pltpu.SMEM),
        compiler_params=pltpu.CompilerParams(
            dimension_semantics=("parallel",),
            vmem_limit_bytes=vmem_limit),
        cost_estimate=cost,
    )(y_s, y_t)

    # Final reduction + batchmean * T^2 scaling (tiny, done in plain XLA).
    return jnp.sum(partials) * (float(T) ** 2) / B


def _distill_kl_ref(y_s, y_t, T):
    log_p_s = jax.nn.log_softmax(y_s / T, axis=1)
    p_t = jax.nn.softmax(y_t / T, axis=1)
    log_p_t = jax.nn.log_softmax(y_t / T, axis=1)
    return jnp.sum(p_t * (log_p_t - log_p_s)) / y_s.shape[0] * T ** 2


if __name__ == "__main__":
    key = jax.random.PRNGKey(0)
    k1, k2 = jax.random.split(key)

    # Small shape consistent with the module: (batch, num_classes).
    B, C = 8, 32
    T = 4.0
    y_s = jax.random.normal(k1, (B, C), dtype=jnp.float32)
    y_t = jax.random.normal(k2, (B, C), dtype=jnp.float32)

    loss = jax.block_until_ready(distill_kl(y_s, y_t, T))
    ref = _distill_kl_ref(y_s, y_t, T)
    assert jnp.allclose(loss, ref, rtol=1e-5, atol=1e-6), (loss, ref)

    # Exercise the ragged (no-pad, masked partial last block) multi-tile path
    # with bf16 input streaming against an f32 reference.
    B2, C2 = 20, 128
    k3, k4 = jax.random.split(k2)
    y_s2 = jax.random.normal(k3, (B2, C2), dtype=jnp.bfloat16)
    y_t2 = jax.random.normal(k4, (B2, C2), dtype=jnp.bfloat16)
    loss2 = jax.block_until_ready(distill_kl(y_s2, y_t2, T, tile_rows=16))
    ref2 = _distill_kl_ref(y_s2.astype(jnp.float32),
                           y_t2.astype(jnp.float32), T)
    assert jnp.allclose(loss2, ref2, rtol=1e-4, atol=1e-5), (loss2, ref2)

    # Exercise the MXU-sum variant (v7x XLU relief) on the same inputs.
    loss3 = jax.block_until_ready(
        distill_kl(y_s2, y_t2, T, tile_rows=16, use_mxu_sums=True))
    assert jnp.allclose(loss3, ref2, rtol=1e-4, atol=1e-5), (loss3, ref2)

    print("KERNEL_OK")
</pallas_src>

<mosaic_0001>
module attributes {stable_mosaic.version = 11 : i64} {
  func.func @_distill_kl_kernel(%arg0: i32, %arg1: memref<8x32xf32, #tpu.memory_space<vmem>>, %arg2: memref<8x32xf32, #tpu.memory_space<vmem>>, %arg3: memref<1x1xf32, #tpu.memory_space<smem>>) attributes {dimension_semantics = [#tpu.dimension_semantics<parallel>], iteration_bounds = array<i64: 1>, scalar_prefetch = 0 : i64, scratch_operands = 0 : i64, tpu.core_type = #tpu.core_type<tc>, window_params = [{transform_indices = @transform_0, window_bounds = array<i64: 8, 32>}, {transform_indices = @transform_1, window_bounds = array<i64: 8, 32>}, {transform_indices = @transform_2, window_bounds = array<i64: 1, 1>}]} {
    %c0 = arith.constant 0 : index
    %c0_0 = arith.constant 0 : index
    %0 = vector.load %arg1[%c0, %c0_0] : memref<8x32xf32, #tpu.memory_space<vmem>>, vector<8x32xf32>
    %cst = arith.constant 2.500000e-01 : f32
    %1 = vector.broadcast %cst : f32 to vector<8x32xf32>
    %2 = arith.mulf %0, %1 : vector<8x32xf32>
    %c0_1 = arith.constant 0 : index
    %c0_2 = arith.constant 0 : index
    %3 = vector.load %arg2[%c0_1, %c0_2] : memref<8x32xf32, #tpu.memory_space<vmem>>, vector<8x32xf32>
    %cst_3 = arith.constant 2.500000e-01 : f32
    %4 = vector.broadcast %cst_3 : f32 to vector<8x32xf32>
    %5 = arith.mulf %3, %4 : vector<8x32xf32>
    %cst_4 = arith.constant dense<0xFF800000> : vector<8xf32>
    %6 = vector.multi_reduction <maximumf>, %2, %cst_4 [1] : vector<8x32xf32> to vector<8xf32>
    %7 = vector.shape_cast %6 : vector<8xf32> to vector<8x1xf32>
    %8 = vector.broadcast %7 : vector<8x1xf32> to vector<8x32xf32>
    %9 = arith.subf %2, %8 : vector<8x32xf32>
    %cst_5 = arith.constant dense<0xFF800000> : vector<8xf32>
    %10 = vector.multi_reduction <maximumf>, %5, %cst_5 [1] : vector<8x32xf32> to vector<8xf32>
    %11 = vector.shape_cast %10 : vector<8xf32> to vector<8x1xf32>
    %12 = vector.broadcast %11 : vector<8x1xf32> to vector<8x32xf32>
    %13 = arith.subf %5, %12 : vector<8x32xf32>
    %14 = math.exp %9 : vector<8x32xf32>
    %15 = math.exp %13 : vector<8x32xf32>
    %16 = arith.subf %13, %9 : vector<8x32xf32>
    %17 = arith.mulf %15, %16 : vector<8x32xf32>
    %cst_6 = arith.constant dense<0.000000e+00> : vector<8xf32>
    %18 = vector.multi_reduction <add>, %14, %cst_6 [1] : vector<8x32xf32> to vector<8xf32>
    %19 = vector.shape_cast %18 : vector<8xf32> to vector<8x1xf32>
    %cst_7 = arith.constant dense<0.000000e+00> : vector<8xf32>
    %20 = vector.multi_reduction <add>, %15, %cst_7 [1] : vector<8x32xf32> to vector<8xf32>
    %21 = vector.shape_cast %20 : vector<8xf32> to vector<8x1xf32>
    %cst_8 = arith.constant dense<0.000000e+00> : vector<8xf32>
    %22 = vector.multi_reduction <add>, %17, %cst_8 [1] : vector<8x32xf32> to vector<8xf32>
    %23 = vector.shape_cast %22 : vector<8xf32> to vector<8x1xf32>
    %24 = arith.divf %23, %21 : vector<8x1xf32>
    %25 = math.log %19 : vector<8x1xf32>
    %26 = arith.addf %24, %25 : vector<8x1xf32>
    %27 = math.log %21 : vector<8x1xf32>
    %28 = arith.subf %26, %27 : vector<8x1xf32>
    %29 = vector.shape_cast %28 : vector<8x1xf32> to vector<1x8x1xf32>
    %cst_9 = arith.constant dense<0.000000e+00> : vector<1xf32>
    %30 = vector.multi_reduction <add>, %29, %cst_9 [1, 2] : vector<1x8x1xf32> to vector<1xf32>
    %31 = vector.shape_cast %30 : vector<1xf32> to vector<1x1x1xf32>
    %32 = vector.extract %31[0, 0, 0] : f32 from vector<1x1x1xf32>
    %c0_10 = arith.constant 0 : index
    %c0_11 = arith.constant 0 : index
    %33 = memref.load %arg3[%c0_10, %c0_11] : memref<1x1xf32, #tpu.memory_space<smem>>
    memref.store %32, %arg3[%c0_10, %c0_11] : memref<1x1xf32, #tpu.memory_space<smem>>
    return
  }
  func.func @transform_0(%arg0: i32) -> (i32, i32) {
    %c0_i32 = arith.constant 0 : i32
    %c0_i32_0 = arith.constant 0 : i32
    return %arg0, %c0_i32 : i32, i32
  }
  func.func @transform_1(%arg0: i32) -> (i32, i32) {
    %c0_i32 = arith.constant 0 : i32
    %c0_i32_0 = arith.constant 0 : i32
    return %arg0, %c0_i32 : i32, i32
  }
  func.func @transform_2(%arg0: i32) -> (i32, i32) {
    %c0_i32 = arith.constant 0 : i32
    %c0_i32_0 = arith.constant 0 : i32
    return %arg0, %c0_i32 : i32, i32
  }
}

</mosaic_0001>

<bundles_post_ra>
// kernel: tpu_custom_call.1
= control target key start
LH: loop header
LB: loop body
LE: loop exit
PB: predicated region body
PF: predicated region fallthrough
CT: control target
= control target key end

     0   :  { %7 = vsyncpa [#allocation3], 0  ;;  %s234_s0 = inlined_call_operand.hbm [shape: f32[8,32], index: 0, kind: input, shape index: {}]   ;;  %s235_s1 = inlined_call_operand.hbm [shape: f32[8,32], index: 1, kind: input, shape index: {}]   ;;  %s236_s2 = inlined_call_operand.hbm [shape: f32[1,1], index: 2, kind: output, shape index: {}]  }
   0x1   :  { %8 = vsyncpa [#allocation6], 0 }
   0x2   :  { %9 = vsyncpa [#allocation4], 0  ;;  %s175_s9 = smov [#allocation2]   ;;  %s176_s11 = smov [#allocation5]  }
   0x3   :  { %s16_s10 = sshll.u32 %s175_s9, 4  ;;  %s26_s12 = sshll.u32 %s176_s11, 4  ;;  %s17_s10 = int_to_ptr.vmem [resolvable:$true] %s16_s10  ;;  %s27_s12 = int_to_ptr.vmem [resolvable:$true] %s26_s12 }
   0x4   :  { %s115_s15 = scalar_lea.hbm %s234_s0, 128 }
   0x5   :  { %p116_p0 = scmp.ne.s32.totalorder %s234_s0, %s115_s15  ;;  %p119_p1 = scmp.lt.u32.totalorder %s115_s15, %s234_s0 }
   0x7   :  { %p121_p2 = pnand %p119_p1, %p116_p0 }
   0x9   :  { %124 = shalt.err (!%p121_p2)
}
   0xa   :  { %s125_s20 = scalar_lea.vmem %s17_s10, 128  ;;  %p130_p4 = scmp.lt.s32.totalorder %s17_s10, %s17_s10 }
   0xb   :  { %p126_p3 = scmp.ne.s32.totalorder %s17_s10, %s125_s20  ;;  %p131_p5 = scmp.lt.s32.totalorder %s125_s20, %s125_s20 }
   0xd   :  { %p132_p6 = por %p131_p5, %p130_p4 }
   0xf   :  { %p133_p7 = pnand %p132_p6, %p126_p3 }
  0x11   :  { %136 = shalt.err (!%p133_p7)
}
  0x12   :  { %19 = dma.hbm_to_vmem [thread:$0]  %s234_s0, 128, %s17_s10, [#allocation3]  }
  0x13   :  { %s137_s25 = scalar_lea.hbm %s235_s1, 128 }
  0x14   :  { %p138_p8 = scmp.ne.s32.totalorder %s235_s1, %s137_s25  ;;  %p141_p9 = scmp.lt.u32.totalorder %s137_s25, %s235_s1 }
  0x16   :  { %p143_p10 = pnand %p141_p9, %p138_p8 }
  0x18   :  { %146 = shalt.err (!%p143_p10)
}
  0x19   :  { %s147_s30 = scalar_lea.vmem %s27_s12, 128  ;;  %p152_p12 = scmp.lt.s32.totalorder %s27_s12, %s27_s12 }
  0x1a   :  { %p148_p11 = scmp.ne.s32.totalorder %s27_s12, %s147_s30  ;;  %p153_p13 = scmp.lt.s32.totalorder %s147_s30, %s147_s30 }
  0x1c   :  { %p154_p0 = por %p153_p13, %p152_p12 }
  0x1e   :  { %p155_p1 = pnand %p154_p0, %p148_p11 }
  0x20   :  { %158 = shalt.err (!%p155_p1)
}
  0x21   :  { %29 = dma.hbm_to_vmem [thread:$0]  %s235_s1, 128, %s27_s12, [#allocation6]  }
  0x22   :  { %169 = dma.done.wait [#allocation3], 128  }
  0x23   :  { %170 = vsyncadd [#allocation3], 4294967168 }
  0x24   :  { %171 = dma.done.wait [#allocation6], 128  }
  0x25   :  { %172 = vsyncadd [#allocation6], 4294967168  ;;  %v36_v0 = vld [vmem:[#allocation2] sm:$0xff]  ;;  %vm40_vm0 = vcmask 261120   ;;  %v38_v1 = vld [vmem:[#allocation5] sm:$0xff]  ;;  %vm72_vm1 = vcmask 7168  }
  0x26   :  { %v37_v2 = vmul.f32 0.25, %v36_v0  ;;  %v39_v3 = vmul.f32 0.25, %v38_v1  ;;  %s159_s6 = scalar_lea.hbm %s236_s2, 16 }
  0x27   :  { %p160_p2 = scmp.ne.s32.totalorder %s236_s2, %s159_s6  ;;  %p163_p3 = scmp.lt.u32.totalorder %s159_s6, %s236_s2 }
  0x28   :  { %v41_v4 = vsel %vm40_vm0, %v37_v2, -inf  ;;  %v45_v5 = vsel %vm40_vm0, %v39_v3, -inf }
  0x29   :  { %42 = vmax.xlane.f32.xlu0 %v41_v4  ;;  %p165_p4 = pnand %p163_p3, %p160_p2 }
  0x2d   :  { %46 = vmax.xlane.f32.xlu0 %v45_v5 }
  0xb6   :  { %v43_v6 = vpop.xlane.xlu0 %42 }
  0xb7   :  { %v44_v7 = vsub.f32 %v37_v2, %v43_v6 }
  0xb9   :  { %v49_v8 = vmul.f32 1.442695, %v44_v7 }
  0xba   :  { %v47_v9 = vpop.xlane.xlu0 %46 }
  0xbb   :  { %105 = vpow2.f32 %v49_v8  ;;  %v48_v10 = vsub.f32 %v39_v3, %v47_v9 }
  0xbd   :  { %v51_v11 = vmul.f32 1.442695, %v48_v10  ;;  %v53_v14 = vsub.f32 %v48_v10, %v44_v7 }
  0xbf   :  { %107 = vpow2.f32 %v51_v11 }
  0xc5   :  { %v106_v12 = vpop.eup %105 }
  0xc6   :  { %v55_v13 = vsel %vm40_vm0, %v106_v12, 0.0 }
  0xc7   :  { %56 = vadd.xlane.f32.xlu1 %v55_v13 }
  0xc9   :  { %v108_v15 = vpop.eup %107 }
  0xca   :  { %v58_v16 = vsel %vm40_vm0, %v108_v15, 0.0  ;;  %v54_v17 = vmul.f32 %v108_v15, %v53_v14 }
  0xcb   :  { %59 = vadd.xlane.f32.xlu1 %v58_v16 }
  0xcc   :  { %v61_v18 = vsel %vm40_vm0, %v54_v17, 0.0 }
  0xcd   :  { %62 = vadd.xlane.f32.xlu0 %v61_v18 }
 0x154   :  { %v57_v19 = vpop.xlane.xlu1 %56 }
 0x155   :  { %109 = vlog2.f32 %v57_v19 }
 0x158   :  { %v60_v20 = vpop.xlane.xlu1 %59 }
 0x159   :  { %111 = vrcp.f32 %v60_v20 }
 0x15a   :  { %113 = vlog2.f32 %v60_v20  ;;  %v63_v23 = vpop.xlane.xlu0 %62 }
 0x15f   :  { %v110_v21 = vpop.eup %109 }
 0x160   :  { %v67_v25 = vmul.f32 0.6931472, %v110_v21 }
 0x163   :  { %v112_v22 = vpop.eup %111 }
 0x164   :  { %v114_v24 = vpop.eup %113  ;;  %v65_v26 = vmul.f32 %v112_v22, %v63_v23 }
 0x165   :  { %v70_v28 = vmul.f32 0.6931472, %v114_v24 }
 0x166   :  { %v68_v27 = vadd.f32 %v67_v25, %v65_v26 }
 0x168   :  { %v71_v29 = vsub.f32 %v68_v27, %v70_v28 }
 0x16a   :  { %v73_v30 = vsel %vm72_vm1, %v71_v29, 0.0 }
 0x16b   :  { %74 = vadd.xlane.f32.xlu1 %v73_v30 }
 0x1f8   :  { %v75_v31 = vpop.xlane.xlu1 %74 }
 0x1f9   :  { %v76_v32 = vrot.slane %v75_v31, 4 }
 0x1fb   :  { %v77_v33 = vadd.f32 %v76_v32, %v75_v31 }
 0x1fd   :  { %v78_v34 = vrot.slane %v77_v33, 2 }
 0x1ff   :  { %v79_v35 = vadd.f32 %v78_v34, %v77_v33 }
 0x201   :  { %v80_v36 = vrot.slane %v79_v35, 1 }
 0x203   :  { %v81_v37 = vadd.f32 %v80_v36, %v79_v35 }
 0x205   :  { %100 = vpush %v81_v37 }
 0x236   :  { %s101_s1 = spop %100 }
 0x237   :  { %84 = sst [smem:[#allocation7]] %s101_s1 }
 0x238   :  { %168 = shalt.err (!%p165_p4)
}
 0x239   :  { %s177_s11 = smov [#allocation7]  }
 0x23a   :  { %92 = dma.smem_to_hbm %s177_s11, 16, %s236_s2, [#allocation4]  }
 0x23b   :  { %173 = dma.done.wait [#allocation4], 16  }
 0x23c   :  { %174 = vsyncadd [#allocation4], 4294967280 }
 0x23d   :  { %96 = sfence }
 0x23e   :  { %97 = vsyncpa [#allocation3], 1 }
 0x23f   :  { %98 = vsyncpa [#allocation6], 1 }
 0x240   :  { %99 = vsyncpa [#allocation4], 1 }

</bundles_post_ra>
